<compile_context>
chip_gen: v5e
topology: v5e:2x2
jax: 0.10.0
libtpu: 0.0.40
codegen_flags: <defaults>
</compile_context>

<pallas_src>
import functools

import jax
import jax.numpy as jnp
from jax import lax
from jax.experimental import pallas as pl
from jax.experimental.pallas import tpu as pltpu

_ROW_TILE = 512                      # rows (B*T) per grid step for row-tiled kernels
_LSTM_CHUNK = 64                     # target timesteps per BiLSTM grid step
_VMEM_LIMIT = 48 * 1024 * 1024       # within v7x's 64 MiB physical VMEM, > 32 MiB default


def _compiler_params(*sem):
    return pltpu.CompilerParams(dimension_semantics=sem, vmem_limit_bytes=_VMEM_LIMIT)


# ---------------------------------------------------------------------------
# in-kernel helpers
# ---------------------------------------------------------------------------
def _uniform_u32(shape, seed, row_off):
    """Stateless per-element uint32 hash (VPU int ops only; works on TPU + interpret)."""
    rows = lax.broadcasted_iota(jnp.int32, shape, 0).astype(jnp.uint32)
    cols = lax.broadcasted_iota(jnp.int32, shape, 1).astype(jnp.uint32)
    seed_c = jnp.uint32((seed * 0x27D4EB2F + 0x165667B1) & 0xFFFFFFFF)
    x = (rows + lax.convert_element_type(row_off, jnp.uint32)) * jnp.uint32(0x9E3779B1)
    x = x + cols * jnp.uint32(0x85EBCA77) + seed_c
    x = x ^ (x >> 15)
    x = x * jnp.uint32(0x2C1B3C6D)
    x = x ^ (x >> 12)
    x = x * jnp.uint32(0x297A2D39)
    x = x ^ (x >> 15)
    return x


def _dropout(x, p, seed, row_off):
    """F.dropout(training=True): Bernoulli(1-p) keep mask, kept values scaled by 1/(1-p)."""
    thresh = jnp.uint32(min(int(round((1.0 - p) * 4294967296.0)), 0xFFFFFFFF))
    keep = _uniform_u32(x.shape, seed, row_off) < thresh
    return jnp.where(keep, x * (1.0 / (1.0 - p)), jnp.zeros_like(x))


# ---------------------------------------------------------------------------
# kernel 1: Prenet  (linear -> relu -> dropout) x 2, bias-free, tiled over B*T rows
# ---------------------------------------------------------------------------
def _prenet_kernel(x_ref, w1_ref, w2_ref, o_ref, *, seed, tile):
    # TODO(synk): the torch NaN/Inf guard (print + exit(1)) has no kernel equivalent.
    row_off = pl.program_id(0) * tile
    h = jnp.dot(x_ref[...], w1_ref[...], preferred_element_type=jnp.float32)
    h = _dropout(jnp.maximum(h, 0.0), 0.5, seed, row_off)
    h = jnp.dot(h, w2_ref[...], preferred_element_type=jnp.float32)
    o_ref[...] = _dropout(jnp.maximum(h, 0.0), 0.5, seed + 1, row_off)


# ---------------------------------------------------------------------------
# kernel 2a: Conv1d via K shifted matmuls on a halo block (no im2col) + accumulation
#            of per-channel sum / sum-of-squares for BatchNorm batch statistics.
# ---------------------------------------------------------------------------
def _conv_stats_kernel(xp_ref, w_ref, b_ref, y_ref, sum_ref, sq_ref, *, ksize):
    b = pl.program_id(0)
    T, E = y_ref.shape
    xp = xp_ref[...]                                       # (T + K - 1, E) halo block
    acc = jnp.zeros((T, E), jnp.float32) + b_ref[...]      # conv bias (kept for fidelity)
    for k in range(ksize):                                 # K shifted (T,E)x(E,E) matmuls
        acc = acc + jnp.dot(xp[k:k + T, :], w_ref[k],
                            preferred_element_type=jnp.float32)
    y_ref[...] = acc

    @pl.when(b == 0)
    def _():
        sum_ref[...] = jnp.zeros_like(sum_ref)
        sq_ref[...] = jnp.zeros_like(sq_ref)

    sum_ref[...] += jnp.sum(acc, axis=0, keepdims=True)    # one-pass sum / sumsq
    sq_ref[...] += jnp.sum(acc * acc, axis=0, keepdims=True)


# ---------------------------------------------------------------------------
# kernel 2b: BatchNorm1d(training, batch stats) normalize + relu + dropout (row-tiled)
# ---------------------------------------------------------------------------
def _bn_relu_drop_kernel(y_ref, scale_ref, shift_ref, o_ref, *, seed, tile):
    row_off = pl.program_id(0) * tile
    y = y_ref[...] * scale_ref[...] + shift_ref[...]
    o_ref[...] = _dropout(jnp.maximum(y, 0.0), 0.5, seed, row_off)


# ---------------------------------------------------------------------------
# kernel 3a: dense matmul + bias (row-tiled) — hoisted LSTM input projection
# ---------------------------------------------------------------------------
def _dense_kernel(x_ref, w_ref, b_ref, o_ref):
    o_ref[...] = (jnp.dot(x_ref[...], w_ref[...], preferred_element_type=jnp.float32)
                  + b_ref[...])


# ---------------------------------------------------------------------------
# kernel 3b: BiLSTM recurrence with pack_padded_sequence semantics.
#   grid = (direction, T-chunk). Input gates (x@W_ih + b) are precomputed, so each
#   step is only the (B,H)x(H,4H) hidden matmul plus gate math. h/c live in VMEM
#   scratch across chunks; the backward direction walks chunks (and steps) reversed.
# ---------------------------------------------------------------------------
def _bilstm_kernel(gin_ref, wh_ref, len_ref, out_ref, h_scr, c_scr, *, chunk_t):
    d = pl.program_id(0)                       # 0 = forward, 1 = backward
    ci = pl.program_id(1)
    nc = pl.num_programs(1)
    c_eff = ci + d * (nc - 1 - 2 * ci)         # backward visits chunks in reverse
    H = wh_ref.shape[0]
    CT = chunk_t

    @pl.when(ci == 0)
    def _():
        h_scr[...] = jnp.zeros_like(h_scr)
        c_scr[...] = jnp.zeros_like(c_scr)

    wh = wh_ref[...]                           # (H, 4H)
    lens = len_ref[...]                        # (B, 1) int32

    def step(s, carry):
        h, c = carry
        t_loc = (1 - d) * s + d * (CT - 1 - s)
        t_glob = c_eff * CT + t_loc
        g = gin_ref[t_loc] + jnp.dot(h, wh, preferred_element_type=jnp.float32)
        i_g = jax.nn.sigmoid(g[:, 0:H])        # PyTorch gate order: i, f, g, o
        f_g = jax.nn.sigmoid(g[:, H:2 * H])
        g_g = jnp.tanh(g[:, 2 * H:3 * H])
        o_g = jax.nn.sigmoid(g[:, 3 * H:4 * H])
        c_new = f_g * c + i_g * g_g
        h_new = o_g * jnp.tanh(c_new)
        # pack_padded semantics: state freezes and output is zero past each length.
        mask = t_glob < lens
        h = jnp.where(mask, h_new, h)
        c = jnp.where(mask, c_new, c)
        out_ref[t_loc] = jnp.where(mask, h, 0.0)
        return h, c

    h_fin, c_fin = lax.fori_loop(0, CT, step, (h_scr[...], c_scr[...]))
    h_scr[...] = h_fin
    c_scr[...] = c_fin


# ---------------------------------------------------------------------------
# wrappers (plain-JAX glue: transposes, padding, tiny BN finalize, param plumbing)
# ---------------------------------------------------------------------------
def _row_tiling(n_rows, target=_ROW_TILE):
    tile = min(n_rows, target)
    n_blocks = pl.cdiv(n_rows, tile)
    return tile, n_blocks, tile * n_blocks


def _pad_rows(x2d, padded_rows):
    if padded_rows == x2d.shape[0]:
        return x2d
    return jnp.pad(x2d, ((0, padded_rows - x2d.shape[0]), (0, 0)))


def prenet_forward(x_bts, w1, w2, seed):
    B, T, S = x_bts.shape
    E = w1.shape[1]
    R = B * T
    tile, nblk, Rp = _row_tiling(R)
    x2d = _pad_rows(x_bts.reshape(R, S), Rp)
    out = pl.pallas_call(
        functools.partial(_prenet_kernel, seed=seed, tile=tile),
        out_shape=jax.ShapeDtypeStruct((Rp, E), jnp.float32),
        grid=(nblk,),
        in_specs=[pl.BlockSpec((tile, S), lambda i: (i, 0)),
                  pl.BlockSpec((S, E), lambda i: (0, 0)),
                  pl.BlockSpec((E, E), lambda i: (0, 0))],
        out_specs=pl.BlockSpec((tile, E), lambda i: (i, 0)),
        compiler_params=_compiler_params("parallel"),
    )(x2d, w1, w2)
    return out[:R].reshape(B, T, E)


def _bn_relu_dropout(y_bte, scale, shift, seed):
    B, T, E = y_bte.shape
    R = B * T
    tile, nblk, Rp = _row_tiling(R)
    y2d = _pad_rows(y_bte.reshape(R, E), Rp)
    out = pl.pallas_call(
        functools.partial(_bn_relu_drop_kernel, seed=seed, tile=tile),
        out_shape=jax.ShapeDtypeStruct((Rp, E), jnp.float32),
        grid=(nblk,),
        in_specs=[pl.BlockSpec((tile, E), lambda i: (i, 0)),
                  pl.BlockSpec((1, E), lambda i: (0, 0)),
                  pl.BlockSpec((1, E), lambda i: (0, 0))],
        out_specs=pl.BlockSpec((tile, E), lambda i: (i, 0)),
        compiler_params=_compiler_params("parallel"),
    )(y2d, scale, shift)
    return out[:R].reshape(B, T, E)


def conv_bn_relu_dropout(x_bte, w_kio, bias, gamma, beta, seed):
    B, T, E = x_bte.shape
    K = w_kio.shape[0]
    pad = (K - 1) // 2
    xp = jnp.pad(x_bte, ((0, 0), (pad, pad), (0, 0)))          # time halo padding
    Tp = T + 2 * pad
    y, s1, s2 = pl.pallas_call(
        functools.partial(_conv_stats_kernel, ksize=K),
        out_shape=(jax.ShapeDtypeStruct((B, T, E), jnp.float32),
                   jax.ShapeDtypeStruct((1, E), jnp.float32),
                   jax.ShapeDtypeStruct((1, E), jnp.float32)),
        grid=(B,),
        in_specs=[pl.BlockSpec((None, Tp, E), lambda b: (b, 0, 0)),
                  pl.BlockSpec((K, E, E), lambda b: (0, 0, 0)),
                  pl.BlockSpec((1, E), lambda b: (0, 0))],
        out_specs=(pl.BlockSpec((None, T, E), lambda b: (b, 0, 0)),
                   pl.BlockSpec((1, E), lambda b: (0, 0)),
                   pl.BlockSpec((1, E), lambda b: (0, 0))),
        compiler_params=_compiler_params("arbitrary"),   # stats accumulate across b
    )(xp, w_kio, bias)
    # finalize BatchNorm1d training-mode statistics (tiny (1,E) math as glue)
    n = jnp.float32(B * T)
    mean = s1 / n
    var = s2 / n - mean * mean                # biased batch variance, one pass
    scale = gamma * lax.rsqrt(var + 1e-5)
    shift = beta - mean * scale
    return _bn_relu_dropout(y, scale, shift, seed)


def _dense(x2d, w, b):
    R, S = x2d.shape
    N = w.shape[1]
    tile, nblk, Rp = _row_tiling(R)
    xpad = _pad_rows(x2d, Rp)
    out = pl.pallas_call(
        _dense_kernel,
        out_shape=jax.ShapeDtypeStruct((Rp, N), jnp.float32),
        grid=(nblk,),
        in_specs=[pl.BlockSpec((tile, S), lambda i: (i, 0)),
                  pl.BlockSpec((S, N), lambda i: (0, 0)),
                  pl.BlockSpec((1, N), lambda i: (0, 0))],
        out_specs=pl.BlockSpec((tile, N), lambda i: (i, 0)),
        compiler_params=_compiler_params("parallel"),
    )(xpad, w, b)
    return out[:R]


def _pick_chunk(T, target=_LSTM_CHUNK):
    c = min(T, target)
    while T % c:
        c -= 1
    return c


def bilstm_forward(x_bte, lengths, lp):
    B, T, E = x_bte.shape
    H = lp["whf"].shape[0]
    # Hoisted input projection: one (B*T, E) x (E, 8H) MXU matmul for both directions.
    w_in = jnp.concatenate([lp["wif"], lp["wib"]], axis=1)       # (E, 8H)
    b_in = jnp.concatenate([lp["bf"], lp["bb"]], axis=1)         # (1, 8H)
    gin = _dense(x_bte.reshape(B * T, E), w_in, b_in)            # (B*T, 8H)
    gin = gin.reshape(B, T, 2, 4 * H).transpose(2, 1, 0, 3)      # (2, T, B, 4H)
    wh = jnp.stack([lp["whf"], lp["whb"]], axis=0)               # (2, H, 4H)
    lens = lengths.reshape(B, 1).astype(jnp.int32)

    CT = _pick_chunk(T)
    nc = T // CT
    out = pl.pallas_call(
        functools.partial(_bilstm_kernel, chunk_t=CT),
        out_shape=jax.ShapeDtypeStruct((2, T, B, H), jnp.float32),
        grid=(2, nc),
        in_specs=[
            pl.BlockSpec((None, CT, B, 4 * H),
                         lambda d, c: (d, c + d * (nc - 1 - 2 * c), 0, 0)),
            pl.BlockSpec((None, H, 4 * H), lambda d, c: (d, 0, 0)),
            pl.BlockSpec((B, 1), lambda d, c: (0, 0)),
        ],
        out_specs=pl.BlockSpec((None, CT, B, H),
                               lambda d, c: (d, c + d * (nc - 1 - 2 * c), 0, 0)),
        scratch_shapes=[pltpu.VMEM((B, H), jnp.float32),
                        pltpu.VMEM((B, H), jnp.float32)],
        compiler_params=_compiler_params("parallel", "arbitrary"),
    )(gin, wh, lens)
    out = jnp.concatenate([out[0], out[1]], axis=-1)             # (T, B, 2H)
    return jnp.transpose(out, (1, 0, 2))                         # (B, T, 2H)


def encoder_forward(params, x_bct, input_lengths):
    """x_bct: (B, n_symbols, T) mirroring the PyTorch NCW input."""
    x = jnp.transpose(x_bct, (0, 2, 1))                          # (B, T, n_symbols)
    x = prenet_forward(x, params["prenet_w1"], params["prenet_w2"], seed=1)
    # torch transposes to (B, E, T) for the convs and back; channels-last cancels both.
    for li, conv in enumerate(params["convs"]):
        x = conv_bn_relu_dropout(x, conv["w"], conv["b"], conv["gamma"],
                                 conv["beta"], seed=10 + li)
    return bilstm_forward(x, input_lengths, params["lstm"])


# ---------------------------------------------------------------------------
# deterministic parameter init (shapes follow the module __init__)
# ---------------------------------------------------------------------------
def init_params(key, n_symbols, emb_dim, n_convs, ksize):
    H = emb_dim // 2

    def u(k, shape, scale):
        return jax.random.uniform(k, shape, jnp.float32, -scale, scale)

    keys = jax.random.split(key, 3 + n_convs)
    params = {
        "prenet_w1": u(keys[0], (n_symbols, emb_dim), 0.3),   # LinearNorm (no bias), (in,out)
        "prenet_w2": u(keys[1], (emb_dim, emb_dim), 0.3),
        "convs": [],
    }
    for i in range(n_convs):
        ck = jax.random.split(keys[2 + i], 2)
        params["convs"].append({
            "w": u(ck[0], (ksize, emb_dim, emb_dim), 0.2),    # Conv1d weight as (K, in, out)
            "b": u(ck[1], (1, emb_dim), 0.1),                 # Conv1d bias
            "gamma": jnp.ones((1, emb_dim), jnp.float32),     # BatchNorm init
            "beta": jnp.zeros((1, emb_dim), jnp.float32),
        })
    lk = jax.random.split(keys[2 + n_convs], 6)
    s = 1.0 / (H ** 0.5)
    params["lstm"] = {
        "wif": u(lk[0], (emb_dim, 4 * H), s),                 # W_ih (fwd), stored (E, 4H)
        "whf": u(lk[1], (H, 4 * H), s),                       # W_hh (fwd)
        "bf": u(lk[2], (1, 4 * H), s),                        # b_ih + b_hh (fwd)
        "wib": u(lk[3], (emb_dim, 4 * H), s),
        "whb": u(lk[4], (H, 4 * H), s),
        "bb": u(lk[5], (1, 4 * H), s),
    }
    return params


if __name__ == "__main__":
    B, T = 2, 8
    n_symbols = 16
    emb_dim = 32            # symbols_embedding_dim == encoder_embedding_dim
    n_convs, ksize = 3, 5

    key = jax.random.PRNGKey(0)
    pkey, xkey = jax.random.split(key)
    params = init_params(pkey, n_symbols, emb_dim, n_convs, ksize)

    x = jax.random.normal(xkey, (B, n_symbols, T), jnp.float32)
    input_lengths = jnp.array([T, 5], jnp.int32)   # sorted descending (pack_padded requirement)

    out = encoder_forward(params, x, input_lengths)
    out = jax.block_until_ready(out)
    assert out.shape == (B, T, emb_dim)
    assert bool(jnp.all(jnp.isfinite(out)))
    # padded positions of sequence 1 (t >= 5) must be zero, as after pad_packed_sequence
    assert bool(jnp.all(out[1, 5:, :] == 0.0))
    print("KERNEL_OK")
</pallas_src>

<mosaic_0001>
module attributes {stable_mosaic.version = 11 : i64} {
  func.func @_prenet_kernel(%arg0: i32, %arg1: memref<16x16xf32, #tpu.memory_space<vmem>>, %arg2: memref<16x32xf32, #tpu.memory_space<vmem>>, %arg3: memref<32x32xf32, #tpu.memory_space<vmem>>, %arg4: memref<16x32xf32, #tpu.memory_space<vmem>>) attributes {dimension_semantics = [#tpu.dimension_semantics<parallel>], iteration_bounds = array<i64: 1>, scalar_prefetch = 0 : i64, scratch_operands = 0 : i64, tpu.core_type = #tpu.core_type<tc>, window_params = [{transform_indices = @transform_0, window_bounds = array<i64: 16, 16>}, {pipeline_mode = #tpu.pipeline_mode<synchronous>, transform_indices = @transform_1, window_bounds = array<i64: 16, 32>}, {pipeline_mode = #tpu.pipeline_mode<synchronous>, transform_indices = @transform_2, window_bounds = array<i64: 32, 32>}, {transform_indices = @transform_3, window_bounds = array<i64: 16, 32>}]} {
    %c16_i32 = arith.constant 16 : i32
    %0 = arith.muli %arg0, %c16_i32 : i32
    %c0 = arith.constant 0 : index
    %c0_0 = arith.constant 0 : index
    %1 = vector.load %arg1[%c0, %c0_0] : memref<16x16xf32, #tpu.memory_space<vmem>>, vector<16x16xf32>
    %c0_1 = arith.constant 0 : index
    %c0_2 = arith.constant 0 : index
    %2 = vector.load %arg2[%c0_1, %c0_2] : memref<16x32xf32, #tpu.memory_space<vmem>>, vector<16x32xf32>
    %cst = arith.constant dense<0.000000e+00> : vector<16x32xf32>
    %3 = tpu.matmul %1, %2, %cst {dimension_numbers = #tpu.dot_dimension_numbers<[1], [0], [0], [1], [0, 0, 1, 1], [], []>} : vector<16x16xf32>, vector<16x32xf32>, vector<16x32xf32> -> vector<16x32xf32>
    %cst_3 = arith.constant 0.000000e+00 : f32
    %4 = vector.broadcast %cst_3 : f32 to vector<16x32xf32>
    %5 = arith.maximumf %3, %4 : vector<16x32xf32>
    %6 = tpu.iota {dimensions = array<i32: 0>} : vector<16x32xi32>
    %7 = tpu.iota {dimensions = array<i32: 1>} : vector<16x32xi32>
    %8 = vector.broadcast %0 : i32 to vector<16x32xi32>
    %9 = arith.addi %6, %8 : vector<16x32xi32>
    %c-1640531535_i32 = arith.constant -1640531535 : i32
    %10 = vector.broadcast %c-1640531535_i32 : i32 to vector<16x32xi32>
    %11 = arith.muli %9, %10 : vector<16x32xi32>
    %c-2048144777_i32 = arith.constant -2048144777 : i32
    %12 = vector.broadcast %c-2048144777_i32 : i32 to vector<16x32xi32>
    %13 = arith.muli %7, %12 : vector<16x32xi32>
    %14 = arith.addi %11, %13 : vector<16x32xi32>
    %c1043026656_i32 = arith.constant 1043026656 : i32
    %15 = vector.broadcast %c1043026656_i32 : i32 to vector<16x32xi32>
    %16 = arith.addi %14, %15 : vector<16x32xi32>
    %c15_i32 = arith.constant 15 : i32
    %17 = vector.broadcast %c15_i32 : i32 to vector<16x32xi32>
    %18 = arith.shrui %16, %17 : vector<16x32xi32>
    %19 = arith.xori %16, %18 : vector<16x32xi32>
    %c739982445_i32 = arith.constant 739982445 : i32
    %20 = vector.broadcast %c739982445_i32 : i32 to vector<16x32xi32>
    %21 = arith.muli %19, %20 : vector<16x32xi32>
    %c12_i32 = arith.constant 12 : i32
    %22 = vector.broadcast %c12_i32 : i32 to vector<16x32xi32>
    %23 = arith.shrui %21, %22 : vector<16x32xi32>
    %24 = arith.xori %21, %23 : vector<16x32xi32>
    %c695872825_i32 = arith.constant 695872825 : i32
    %25 = vector.broadcast %c695872825_i32 : i32 to vector<16x32xi32>
    %26 = arith.muli %24, %25 : vector<16x32xi32>
    %c15_i32_4 = arith.constant 15 : i32
    %27 = vector.broadcast %c15_i32_4 : i32 to vector<16x32xi32>
    %28 = arith.shrui %26, %27 : vector<16x32xi32>
    %29 = arith.xori %26, %28 : vector<16x32xi32>
    %c-2147483648_i32 = arith.constant -2147483648 : i32
    %30 = vector.broadcast %c-2147483648_i32 : i32 to vector<16x32xi32>
    %31 = arith.cmpi ult, %29, %30 : vector<16x32xi32>
    %cst_5 = arith.constant 2.000000e+00 : f32
    %32 = vector.broadcast %cst_5 : f32 to vector<16x32xf32>
    %33 = arith.mulf %5, %32 : vector<16x32xf32>
    %cst_6 = arith.constant 0.000000e+00 : f32
    %34 = vector.broadcast %cst_6 : f32 to vector<16x32xf32>
    %35 = arith.select %31, %33, %34 : vector<16x32xi1>, vector<16x32xf32>
    %c0_7 = arith.constant 0 : index
    %c0_8 = arith.constant 0 : index
    %36 = vector.load %arg3[%c0_7, %c0_8] : memref<32x32xf32, #tpu.memory_space<vmem>>, vector<32x32xf32>
    %cst_9 = arith.constant dense<0.000000e+00> : vector<16x32xf32>
    %37 = tpu.matmul %35, %36, %cst_9 {dimension_numbers = #tpu.dot_dimension_numbers<[1], [0], [0], [1], [0, 0, 1, 1], [], []>} : vector<16x32xf32>, vector<32x32xf32>, vector<16x32xf32> -> vector<16x32xf32>
    %cst_10 = arith.constant 0.000000e+00 : f32
    %38 = vector.broadcast %cst_10 : f32 to vector<16x32xf32>
    %39 = arith.maximumf %37, %38 : vector<16x32xf32>
    %40 = tpu.iota {dimensions = array<i32: 0>} : vector<16x32xi32>
    %41 = tpu.iota {dimensions = array<i32: 1>} : vector<16x32xi32>
    %42 = vector.broadcast %0 : i32 to vector<16x32xi32>
    %43 = arith.addi %40, %42 : vector<16x32xi32>
    %c-1640531535_i32_11 = arith.constant -1640531535 : i32
    %44 = vector.broadcast %c-1640531535_i32_11 : i32 to vector<16x32xi32>
    %45 = arith.muli %43, %44 : vector<16x32xi32>
    %c-2048144777_i32_12 = arith.constant -2048144777 : i32
    %46 = vector.broadcast %c-2048144777_i32_12 : i32 to vector<16x32xi32>
    %47 = arith.muli %41, %46 : vector<16x32xi32>
    %48 = arith.addi %45, %47 : vector<16x32xi32>
    %c1711291919_i32 = arith.constant 1711291919 : i32
    %49 = vector.broadcast %c1711291919_i32 : i32 to vector<16x32xi32>
    %50 = arith.addi %48, %49 : vector<16x32xi32>
    %c15_i32_13 = arith.constant 15 : i32
    %51 = vector.broadcast %c15_i32_13 : i32 to vector<16x32xi32>
    %52 = arith.shrui %50, %51 : vector<16x32xi32>
    %53 = arith.xori %50, %52 : vector<16x32xi32>
    %c739982445_i32_14 = arith.constant 739982445 : i32
    %54 = vector.broadcast %c739982445_i32_14 : i32 to vector<16x32xi32>
    %55 = arith.muli %53, %54 : vector<16x32xi32>
    %c12_i32_15 = arith.constant 12 : i32
    %56 = vector.broadcast %c12_i32_15 : i32 to vector<16x32xi32>
    %57 = arith.shrui %55, %56 : vector<16x32xi32>
    %58 = arith.xori %55, %57 : vector<16x32xi32>
    %c695872825_i32_16 = arith.constant 695872825 : i32
    %59 = vector.broadcast %c695872825_i32_16 : i32 to vector<16x32xi32>
    %60 = arith.muli %58, %59 : vector<16x32xi32>
    %c15_i32_17 = arith.constant 15 : i32
    %61 = vector.broadcast %c15_i32_17 : i32 to vector<16x32xi32>
    %62 = arith.shrui %60, %61 : vector<16x32xi32>
    %63 = arith.xori %60, %62 : vector<16x32xi32>
    %c-2147483648_i32_18 = arith.constant -2147483648 : i32
    %64 = vector.broadcast %c-2147483648_i32_18 : i32 to vector<16x32xi32>
    %65 = arith.cmpi ult, %63, %64 : vector<16x32xi32>
    %cst_19 = arith.constant 2.000000e+00 : f32
    %66 = vector.broadcast %cst_19 : f32 to vector<16x32xf32>
    %67 = arith.mulf %39, %66 : vector<16x32xf32>
    %cst_20 = arith.constant 0.000000e+00 : f32
    %68 = vector.broadcast %cst_20 : f32 to vector<16x32xf32>
    %69 = arith.select %65, %67, %68 : vector<16x32xi1>, vector<16x32xf32>
    %c0_21 = arith.constant 0 : index
    %c0_22 = arith.constant 0 : index
    %70 = vector.load %arg4[%c0_21, %c0_22] : memref<16x32xf32, #tpu.memory_space<vmem>>, vector<16x32xf32>
    tpu.vector_store %arg4[%c0_21, %c0_22], %69 {strides = array<i32>} : memref<16x32xf32, #tpu.memory_space<vmem>>, vector<16x32xf32>,
    return
  }
  func.func @transform_0(%arg0: i32) -> (i32, i32) {
    %c0_i32 = arith.constant 0 : i32
    %c0_i32_0 = arith.constant 0 : i32
    return %arg0, %c0_i32 : i32, i32
  }
  func.func @transform_1(%arg0: i32) -> (i32, i32) {
    %c0_i32 = arith.constant 0 : i32
    %c0_i32_0 = arith.constant 0 : i32
    %c0_i32_1 = arith.constant 0 : i32
    return %c0_i32, %c0_i32_0 : i32, i32
  }
  func.func @transform_2(%arg0: i32) -> (i32, i32) {
    %c0_i32 = arith.constant 0 : i32
    %c0_i32_0 = arith.constant 0 : i32
    %c0_i32_1 = arith.constant 0 : i32
    return %c0_i32, %c0_i32_0 : i32, i32
  }
  func.func @transform_3(%arg0: i32) -> (i32, i32) {
    %c0_i32 = arith.constant 0 : i32
    %c0_i32_0 = arith.constant 0 : i32
    return %arg0, %c0_i32 : i32, i32
  }
}

</mosaic_0001>

<bundles_post_ra>
// kernel: tpu_custom_call.1
= control target key start
LH: loop header
LB: loop body
LE: loop exit
PB: predicated region body
PF: predicated region fallthrough
CT: control target
= control target key end

     0   :  { %8 = vsyncpa [#allocation3], 0  ;;  %s402_s0 = inlined_call_operand.hbm [shape: f32[16,16], index: 0, kind: input, shape index: {}]   ;;  %s403_s1 = inlined_call_operand.hbm [shape: f32[16,32], index: 1, kind: input, shape index: {}]   ;;  %s404_s2 = inlined_call_operand.hbm [shape: f32[32,32], index: 2, kind: input, shape index: {}]   ;;  %s405_s3 = inlined_call_operand.hbm [shape: f32[16,32], index: 3, kind: output, shape index: {}]  }
   0x1   :  { %9 = vsyncpa [#allocation6], 0 }
   0x2   :  { %10 = vsyncpa [#allocation4], 0  ;;  %s28_s14 = sshll.u32 %s403_s1, 4  ;;  %s348_s15 = smov [#allocation5]   ;;  %s29_s14 = int_to_ptr.hbm [resolvable:$true] %s28_s14 }
   0x3   :  { %s30_s16 = sshll.u32 %s348_s15, 4  ;;  %s15_s19 = sshll.u32 %s402_s0, 4  ;;  %s31_s16 = int_to_ptr.vmem [resolvable:$true] %s30_s16  ;;  %s16_s19 = int_to_ptr.hbm [resolvable:$true] %s15_s19 }
   0x4   :  { %s349_s20 = smov 128   ;;  %s350_s21 = smov 8  }
   0x5   :  { %36 = dma.hbm_to_vmem [thread:$0]  %s29_s14, 256, %s31_s16, [#allocation6], %s349_s20, %s349_s20, %s350_s21  }
   0x6   :  { %s351_s22 = smov [#allocation2]   ;;  %s41_s1 = sshll.u32 %s404_s2, 4  ;;  %s42_s1 = int_to_ptr.hbm [resolvable:$true] %s41_s1 }
   0x7   :  { %s17_s23 = sshll.u32 %s351_s22, 4  ;;  %s352_s0 = smov [#allocation7]   ;;  %s18_s23 = int_to_ptr.vmem [resolvable:$true] %s17_s23 }
   0x8   :  { %23 = dma.hbm_to_vmem [thread:$0]  %s16_s19, 256, %s18_s23, [#allocation3], %s349_s20, %s349_s20, %s350_s21  }
   0x9   :  { %s43_s26 = sshll.u32 %s352_s0, 4  ;;  %s44_s26 = int_to_ptr.vmem [resolvable:$true] %s43_s26 }
   0xa   :  { %49 = dma.hbm_to_vmem [thread:$0]  %s42_s1, 512, %s44_s26, [#allocation6], %s349_s20, %s349_s20, %s350_s21  }
   0xb   :  { %342 = dma.done.wait [#allocation3], 256  }
   0xc   :  { %343 = vsyncadd [#allocation3], 4294967040 }
   0xd   :  { %344 = dma.done.wait [#allocation6], 768  }
   0xe   :  { %345 = vsyncadd [#allocation6], 4294966528  ;;  %v66_v0 = vld [vmem:[#allocation5 + $0x8] sm:$0xff]  ;;  %v65_v1 = vld [vmem:[#allocation5] sm:$0xff]  ;;  %vm67_vm0 = vcmask 130048   ;;  %v99_v5 = vlaneseq  ;;  %vm144_vm2 = vcmask 261120  }
   0xf   :  { %234 = vmatpush.msra.mxu3 %v66_v0  ;;  %v64_v2 = vld [vmem:[#allocation2 + $0x8] sm:$0xff]  ;;  %88 = vmatpush.msra.mxu0 %v66_v0  ;;  %v63_v3 = vld [vmem:[#allocation2] sm:$0xff]  ;;  %v143_v4 = vld [vmem:[#allocation7 + $0x18] sm:$0xff]  ;;  %s353_s2 = smov [#allocation8]   ;;  %s212_s30 = sshll.u32 %s405_s3, 4  ;;  %s213_s30 = int_to_ptr.hbm [resolvable:$true] %s212_s30 }
  0x10   :  { %236 = vmatpush.msra.mxu2 %v143_v4  ;;  %163 = vmatpush.msra.mxu1 %v143_v4  ;;  %v100_v6 = vshrl.u32 %v99_v5, 7  ;;  %v103_v8 = vand.u32 127, %v99_v5  ;;  %v142_v19 = vld [vmem:[#allocation7 + $0x10] sm:$0xff]  ;;  %v141_v21 = vld [vmem:[#allocation7 + $0x8] sm:$0xff]  ;;  %v140_v23 = vld [vmem:[#allocation7] sm:$0xff]  ;;  %s210_s27 = sshll.u32 %s353_s2, 4  ;;  %s211_s27 = int_to_ptr.vmem [resolvable:$true] %s210_s27 }
  0x11   :  { %235 = vmatpush.msra.mxu3 %v65_v1  ;;  %89 = vmatpush.msra.mxu0 %v65_v1 }
  0x12   :  { %227 = vmatmul.msk.f32.vlgmr.msra.gmra.mxu3 %vm67_vm0, %v64_v2  ;;  %226 = vmatmul.msk.f32.vlgmr.msra.gmra.mxu0 %vm67_vm0, %v63_v3  ;;  %v101_v7 = vadd.s32 8, %v100_v6  ;;  %v109_v10 = vmul.u32 2246822519, %v103_v8  ;;  %v107_v11 = vmul.u32 2654435761, %v100_v6 }
  0x13   :  { %237 = vmatpush.msra.mxu2 %v142_v19  ;;  %164 = vmatpush.msra.mxu1 %v142_v19 }
  0x14   :  { %v108_v9 = vmul.u32 2654435761, %v101_v7  ;;  %v110_v12 = vadd.s32 %v109_v10, %v107_v11 }
  0x15   :  { %238 = vmatpush.msra.mxu2 %v141_v21  ;;  %165 = vmatpush.msra.mxu1 %v141_v21 }
  0x16   :  { %v111_v13 = vadd.s32 %v109_v10, %v108_v9  ;;  %v112_v14 = vadd.s32 1043026656, %v110_v12  ;;  %v176_v45 = vadd.s32 1711291919, %v110_v12 }
  0x17   :  { %239 = vmatpush.msra.mxu2 %v140_v23  ;;  %166 = vmatpush.msra.mxu1 %v140_v23 }
  0x18   :  { %v114_v15 = vshrl.u32 %v112_v14, 15  ;;  %v113_v16 = vadd.s32 1043026656, %v111_v13  ;;  %v178_v46 = vshrl.u32 %v176_v45, 15  ;;  %v177_v49 = vadd.s32 1711291919, %v111_v13 }
  0x1a   :  { %v116_v17 = vxor.u32 %v114_v15, %v112_v14  ;;  %v115_v18 = vshrl.u32 %v113_v16, 15  ;;  %v180_v47 = vxor.u32 %v178_v46, %v176_v45  ;;  %v179_v51 = vshrl.u32 %v177_v49, 15 }
  0x1c   :  { %v118_v20 = vmul.u32 739982445, %v116_v17  ;;  %v117_v22 = vxor.u32 %v115_v18, %v113_v16  ;;  %v182_v48 = vmul.u32 739982445, %v180_v47  ;;  %v181_v53 = vxor.u32 %v179_v51, %v177_v49 }
  0x1e   :  { %v120_v24 = vshrl.u32 %v118_v20, 12  ;;  %v119_v25 = vmul.u32 739982445, %v117_v22  ;;  %v184_v50 = vshrl.u32 %v182_v48, 12  ;;  %v183_v55 = vmul.u32 739982445, %v181_v53 }
  0x20   :  { %v122_v26 = vxor.u32 %v120_v24, %v118_v20  ;;  %v121_v27 = vshrl.u32 %v119_v25, 12  ;;  %v186_v52 = vxor.u32 %v184_v50, %v182_v48  ;;  %v185_v57 = vshrl.u32 %v183_v55, 12 }
  0x22   :  { %v124_v28 = vmul.u32 695872825, %v122_v26  ;;  %v123_v29 = vxor.u32 %v121_v27, %v119_v25  ;;  %v188_v54 = vmul.u32 695872825, %v186_v52  ;;  %v187_v59 = vxor.u32 %v185_v57, %v183_v55 }
  0x24   :  { %v126_v30 = vshrl.u32 %v124_v28, 15  ;;  %v125_v31 = vmul.u32 695872825, %v123_v29  ;;  %v190_v56 = vshrl.u32 %v188_v54, 15  ;;  %v189_v61 = vmul.u32 695872825, %v187_v59 }
  0x26   :  { %v128_v32 = vxor.u32 %v126_v30, %v124_v28  ;;  %v127_v33 = vshrl.u32 %v125_v31, 15  ;;  %v192_v58 = vxor.u32 %v190_v56, %v188_v54  ;;  %v191_v0 = vshrl.u32 %v189_v61, 15 }
  0x28   :  { %v228_v34 = vxor.u32 2147483648, %v128_v32  ;;  %v129_v36 = vxor.u32 %v127_v33, %v125_v31  ;;  %v232_v60 = vxor.u32 2147483648, %v192_v58  ;;  %v193_v3 = vxor.u32 %v191_v0, %v189_v61 }
  0x2a   :  { %vm132_vm1 = vcmp.lt.s32.totalorder %v228_v34, 0  ;;  %v229_v39 = vxor.u32 2147483648, %v129_v36  ;;  %vm196_vm4 = vcmp.lt.s32.totalorder %v232_v60, 0  ;;  %v233_v4 = vxor.u32 2147483648, %v193_v3 }
  0x2c   :  { %vm135_vm3 = vcmp.lt.s32.totalorder %v229_v39, 0  ;;  %vm199_vm5 = vcmp.lt.s32.totalorder %v233_v4, 0 }
  0x8f   :  { %v91_v35 = vpop.f32.mrf.mxu0 }
  0x90   :  { %v97_v37 = vmax.f32 %v91_v35, 0.0 }
  0x92   :  { %v136_v38 = vmul.f32 2.0, %v97_v37 }
  0x94   :  { %v138_v40 = vsel %vm132_vm1, %v136_v38, 0.0 }
  0x95   :  { %v94_v41 = vpop.f32.mrf.mxu3  ;;  %230 = vmatmul.msk.f32.vlgmr.msra.gmra.mxu1 %vm144_vm2, %v138_v40 }
  0x96   :  { %v98_v42 = vmax.f32 %v94_v41, 0.0 }
  0x98   :  { %v137_v43 = vmul.f32 2.0, %v98_v42 }
  0x9a   :  { %v139_v44 = vsel %vm135_vm3, %v137_v43, 0.0 }
  0x9b   :  { %231 = vmatmul.msk.f32.vlgmr.msra.gmra.mxu2 %vm144_vm2, %v139_v44 }
 0x112   :  { %v168_v62 = vpop.f32.mrf.mxu1 }
 0x113   :  { %v174_v63 = vmax.f32 %v168_v62, 0.0 }
 0x115   :  { %v200_v1 = vmul.f32 2.0, %v174_v63 }
 0x117   :  { %v202_v2 = vsel %vm196_vm4, %v200_v1, 0.0 }
 0x118   :  { %204 = vst.msk [vmem:[#allocation8] sm:$0xff] %vm144_vm2, %v202_v2 }
 0x11e   :  { %v171_v5 = vpop.f32.mrf.mxu2 }
 0x11f   :  { %v175_v6 = vmax.f32 %v171_v5, 0.0 }
 0x121   :  { %v201_v7 = vmul.f32 2.0, %v175_v6 }
 0x123   :  { %v203_v8 = vsel %vm199_vm5, %v201_v7, 0.0 }
 0x124   :  { %205 = vst.msk [vmem:[#allocation8 + $0x8] sm:$0xff] %vm144_vm2, %v203_v8 }
 0x125   :  { %218 = dma.vmem_to_hbm [thread:$0]  %s211_s27, 256, %s213_s30, [#allocation4], %s349_s20, %s349_s20, %s350_s21  }
 0x126   :  { %346 = dma.done.wait [#allocation4], 256  }
 0x127   :  { %347 = vsyncadd [#allocation4], 4294967040 }
 0x128   :  { %223 = vsyncpa [#allocation3], 1 }
 0x129   :  { %224 = vsyncpa [#allocation6], 1 }
 0x12a   :  { %225 = vsyncpa [#allocation4], 1 }

</bundles_post_ra>
